<compile_context>
chip_gen: v6e
topology: v6e:2x2x1
jax: 0.10.0
libtpu: 0.0.40
codegen_flags: <defaults>
</compile_context>

<pallas_src>
import jax
import jax.numpy as jnp
from jax.experimental import pallas as pl
from jax.experimental.pallas import tpu as pltpu

_LANE = 128


def _make_sumall_kernel(tb: int, tw: int):
    n_chunks = tw // _LANE

    def kernel(x_ref, o_ref, acc_ref):
        k = pl.program_id(1)

        @pl.when(k == 0)
        def _():
            acc_ref[...] = jnp.zeros_like(acc_ref)

        # Fold the (tb, tw) lane-dense tile down to one (tb, 128) f32 slab with
        # VPU adds only; slices are static and 128-lane aligned (no relayout).
        partial = x_ref[:, 0:_LANE].astype(jnp.float32)
        for c in range(1, n_chunks):
            partial = partial + x_ref[:, c * _LANE:(c + 1) * _LANE].astype(jnp.float32)
        acc_ref[...] += partial

        # One cross-lane reduce + store per output row-block, at the last step.
        @pl.when(k == pl.num_programs(1) - 1)
        def _():
            o_ref[...] = jnp.sum(acc_ref[...], axis=1, keepdims=True).astype(o_ref.dtype)

    return kernel


def sum_all(x: jax.Array, *, block_rows: int = 8, max_tile_width: int = 2048) -> jax.Array:
    """Equivalent of torch: input.sum(dim=[1, 2, 3]) for a 4D NCHW tensor."""
    N, C, H, W = x.shape
    chw = C * H * W

    # Lane-dense flatten: contiguous reshape, no data movement.
    xf = x.reshape(N, chw)

    # Reduction tile width: multiple of 128 lanes, capped (512-2048 sweet spot).
    tw = min(max_tile_width, pl.cdiv(chw, _LANE) * _LANE)
    chw_p = pl.cdiv(chw, tw) * tw
    tb = block_rows
    n_p = pl.cdiv(N, tb) * tb

    # Zero-pad rows / lanes so blocks tile exactly (zeros don't change sums).
    if (n_p, chw_p) != (N, chw):
        xf = jnp.pad(xf, ((0, n_p - N), (0, chw_p - chw)))

    grid = (n_p // tb, chw_p // tw)
    kernel = _make_sumall_kernel(tb, tw)

    out2d = pl.pallas_call(
        kernel,
        out_shape=jax.ShapeDtypeStruct((n_p, 1), x.dtype),
        grid_spec=pltpu.PrefetchScalarGridSpec(
            num_scalar_prefetch=0,
            grid=grid,
            in_specs=[pl.BlockSpec((tb, tw), lambda i, k: (i, k))],
            out_specs=pl.BlockSpec((tb, 1), lambda i, k: (i, 0)),
            scratch_shapes=[pltpu.VMEM((tb, _LANE), jnp.float32)],
        ),
        compiler_params=pltpu.CompilerParams(
            dimension_semantics=("parallel", "arbitrary"),
        ),
    )(xf)
    return out2d[:N, 0]


if __name__ == "__main__":
    key = jax.random.PRNGKey(0)
    x = jax.random.normal(key, (2, 4, 16, 16), dtype=jnp.float32)

    out = sum_all(x)
    jax.block_until_ready(out)

    # correctness check against plain-JAX reference
    ref = jnp.sum(x, axis=(1, 2, 3))
    assert out.shape == (2,), out.shape
    assert jnp.allclose(out, ref, atol=1e-4, rtol=1e-5), (out, ref)

    print("KERNEL_OK")
</pallas_src>

<mosaic_0001>
module attributes {stable_mosaic.version = 11 : i64} {
  func.func @kernel(%arg0: i32, %arg1: i32, %arg2: memref<8x1024xf32, #tpu.memory_space<vmem>>, %arg3: memref<8x1xf32, #tpu.memory_space<vmem>>, %arg4: memref<8x128xf32, #tpu.memory_space<vmem>>) attributes {dimension_semantics = [#tpu.dimension_semantics<parallel>, #tpu.dimension_semantics<arbitrary>], iteration_bounds = array<i64: 1, 1>, scalar_prefetch = 0 : i64, scratch_operands = 1 : i64, tpu.core_type = #tpu.core_type<tc>, window_params = [{transform_indices = @transform_0, window_bounds = array<i64: 8, 1024>}, {transform_indices = @transform_1, window_bounds = array<i64: 8, 1>}]} {
    %c0_i32 = arith.constant 0 : i32
    %0 = arith.cmpi eq, %arg1, %c0_i32 : i32
    %1 = arith.extui %0 : i1 to i32
    %c0_i32_0 = arith.constant 0 : i32
    %2 = arith.cmpi ne, %1, %c0_i32_0 : i32
    scf.if %2 {
      %cst = arith.constant 0.000000e+00 : f32
      %24 = vector.broadcast %cst : f32 to vector<8x128xf32>
      %c0_15 = arith.constant 0 : index
      %c0_16 = arith.constant 0 : index
      %25 = vector.load %arg4[%c0_15, %c0_16] : memref<8x128xf32, #tpu.memory_space<vmem>>, vector<8x128xf32>
      tpu.vector_store %arg4[%c0_15, %c0_16], %24 {strides = array<i32>} : memref<8x128xf32, #tpu.memory_space<vmem>>, vector<8x128xf32>,
    } else {
    }
    %c0 = arith.constant 0 : index
    %c0_1 = arith.constant 0 : index
    %3 = vector.load %arg2[%c0, %c0_1] : memref<8x1024xf32, #tpu.memory_space<vmem>>, vector<8x128xf32>
    %c0_2 = arith.constant 0 : index
    %c128 = arith.constant 128 : index
    %4 = vector.load %arg2[%c0_2, %c128] : memref<8x1024xf32, #tpu.memory_space<vmem>>, vector<8x128xf32>
    %5 = arith.addf %3, %4 : vector<8x128xf32>
    %c0_3 = arith.constant 0 : index
    %c256 = arith.constant 256 : index
    %6 = vector.load %arg2[%c0_3, %c256] : memref<8x1024xf32, #tpu.memory_space<vmem>>, vector<8x128xf32>
    %7 = arith.addf %5, %6 : vector<8x128xf32>
    %c0_4 = arith.constant 0 : index
    %c384 = arith.constant 384 : index
    %8 = vector.load %arg2[%c0_4, %c384] : memref<8x1024xf32, #tpu.memory_space<vmem>>, vector<8x128xf32>
    %9 = arith.addf %7, %8 : vector<8x128xf32>
    %c0_5 = arith.constant 0 : index
    %c512 = arith.constant 512 : index
    %10 = vector.load %arg2[%c0_5, %c512] : memref<8x1024xf32, #tpu.memory_space<vmem>>, vector<8x128xf32>
    %11 = arith.addf %9, %10 : vector<8x128xf32>
    %c0_6 = arith.constant 0 : index
    %c640 = arith.constant 640 : index
    %12 = vector.load %arg2[%c0_6, %c640] : memref<8x1024xf32, #tpu.memory_space<vmem>>, vector<8x128xf32>
    %13 = arith.addf %11, %12 : vector<8x128xf32>
    %c0_7 = arith.constant 0 : index
    %c768 = arith.constant 768 : index
    %14 = vector.load %arg2[%c0_7, %c768] : memref<8x1024xf32, #tpu.memory_space<vmem>>, vector<8x128xf32>
    %15 = arith.addf %13, %14 : vector<8x128xf32>
    %c0_8 = arith.constant 0 : index
    %c896 = arith.constant 896 : index
    %16 = vector.load %arg2[%c0_8, %c896] : memref<8x1024xf32, #tpu.memory_space<vmem>>, vector<8x128xf32>
    %17 = arith.addf %15, %16 : vector<8x128xf32>
    %c0_9 = arith.constant 0 : index
    %c0_10 = arith.constant 0 : index
    %18 = vector.load %arg4[%c0_9, %c0_10] : memref<8x128xf32, #tpu.memory_space<vmem>>, vector<8x128xf32>
    %19 = arith.addf %18, %17 : vector<8x128xf32>
    %c0_11 = arith.constant 0 : index
    %c0_12 = arith.constant 0 : index
    %20 = vector.load %arg4[%c0_11, %c0_12] : memref<8x128xf32, #tpu.memory_space<vmem>>, vector<8x128xf32>
    tpu.vector_store %arg4[%c0_11, %c0_12], %19 {strides = array<i32>} : memref<8x128xf32, #tpu.memory_space<vmem>>, vector<8x128xf32>,
    %c0_i32_13 = arith.constant 0 : i32
    %21 = arith.cmpi eq, %arg1, %c0_i32_13 : i32
    %22 = arith.extui %21 : i1 to i32
    %c0_i32_14 = arith.constant 0 : i32
    %23 = arith.cmpi ne, %22, %c0_i32_14 : i32
    scf.if %23 {
      %c0_15 = arith.constant 0 : index
      %c0_16 = arith.constant 0 : index
      %24 = vector.load %arg4[%c0_15, %c0_16] : memref<8x128xf32, #tpu.memory_space<vmem>>, vector<8x128xf32>
      %cst = arith.constant dense<0.000000e+00> : vector<8xf32>
      %25 = vector.multi_reduction <add>, %24, %cst [1] : vector<8x128xf32> to vector<8xf32>
      %26 = vector.shape_cast %25 : vector<8xf32> to vector<8x1xf32>
      %c0_17 = arith.constant 0 : index
      %c0_18 = arith.constant 0 : index
      %27 = vector.load %arg3[%c0_17, %c0_18] : memref<8x1xf32, #tpu.memory_space<vmem>>, vector<8x1xf32>
      tpu.vector_store %arg3[%c0_17, %c0_18], %26 {strides = array<i32>} : memref<8x1xf32, #tpu.memory_space<vmem>>, vector<8x1xf32>,
    } else {
    }
    return
  }
  func.func @transform_0(%arg0: i32, %arg1: i32) -> (i32, i32) {
    %c0_i32 = arith.constant 0 : i32
    return %arg0, %arg1 : i32, i32
  }
  func.func @transform_1(%arg0: i32, %arg1: i32) -> (i32, i32) {
    %c0_i32 = arith.constant 0 : i32
    %c0_i32_0 = arith.constant 0 : i32
    return %arg0, %c0_i32 : i32, i32
  }
}

</mosaic_0001>

<bundles_post_ra>
// kernel: tpu_custom_call.1
= control target key start
LH: loop header
LB: loop body
LE: loop exit
PB: predicated region body
PF: predicated region fallthrough
CT: control target
= control target key end

     0   :  { %6 = vsyncpa [#allocation4], 0  ;;  %s79_s6 = smov [#allocation3]   ;;  %s96_s0 = inlined_call_operand.hbm [shape: f32[8,1024], index: 0, kind: input, shape index: {}]   ;;  %s97_s1 = inlined_call_operand.vmem [shape: f32[8,1], index: 1, kind: output, shape index: {}]  }
   0x1   :  { %s13_s7 = sshll.u32 %s79_s6, 4  ;;  %s14_s7 = int_to_ptr.vmem [resolvable:$true] %s13_s7 }
   0x2   :  { %s65_s8 = scalar_lea.vmem %s14_s7, 1024  ;;  %p70_p1 = scmp.lt.s32.totalorder %s14_s7, %s14_s7 }
   0x3   :  { %p66_p0 = scmp.ne.s32.totalorder %s14_s7, %s65_s8  ;;  %p71_p2 = scmp.lt.s32.totalorder %s65_s8, %s65_s8 }
   0x5   :  { %p72_p3 = por %p71_p2, %p70_p1 }
   0x7   :  { %p73_p4 = pnand %p72_p3, %p66_p0 }
   0x9   :  { %76 = shalt.err (!%p73_p4)
}
   0xa   :  { %16 = dma.hbm_to_vmem [thread:$0]  %s96_s0, 1024, %s14_s7, [#allocation4]  }
   0xb   :  { %77 = dma.done.wait [#allocation4], 1024  }
   0xc   :  { %78 = vsyncadd [#allocation4], 4294966272  ;;  %v25_v0 = vld [vmem:[#allocation3] sm:$0xff]  ;;  %v26_v1 = vld [vmem:[#allocation3 + $0x8] sm:$0xff]  ;;  %vm49_vm0 = vcmask 7168  }
   0xd   :  { %v28_v2 = vld [vmem:[#allocation3 + $0x10] sm:$0xff]  ;;  %v27_v3 = vadd.f32 %v26_v1, %v25_v0  ;;  %v30_v4 = vld [vmem:[#allocation3 + $0x18] sm:$0xff]  ;;  %v32_v6 = vld [vmem:[#allocation3 + $0x20] sm:$0xff] }
   0xe   :  { %v34_v8 = vld [vmem:[#allocation3 + $0x28] sm:$0xff]  ;;  %v36_v10 = vld [vmem:[#allocation3 + $0x30] sm:$0xff]  ;;  %v38_v12 = vld [vmem:[#allocation3 + $0x38] sm:$0xff] }
   0xf   :  { %v29_v5 = vadd.f32 %v28_v2, %v27_v3 }
  0x11   :  { %v31_v7 = vadd.f32 %v30_v4, %v29_v5 }
  0x13   :  { %v33_v9 = vadd.f32 %v32_v6, %v31_v7 }
  0x15   :  { %v35_v11 = vadd.f32 %v34_v8, %v33_v9 }
  0x17   :  { %v37_v13 = vadd.f32 %v36_v10, %v35_v11 }
  0x19   :  { %v39_v14 = vadd.f32 %v38_v12, %v37_v13 }
  0x1b   :  { %47 = vadd.xlane.f32.xlu0 %v39_v14 }
  0xa4   :  { %v48_v15 = vpop.xlane.xlu0 %47 }
  0xa5   :  { %50 = vst.msk [vmem:[%s97_s1] sm:$0xff] %vm49_vm0, %v48_v15 }
  0xa6   :  { %55 = vsyncpa [#allocation4], 1 }

</bundles_post_ra>
